<compile_context>
chip_gen: v7x
topology: tpu7x:2x2x1
jax: 0.10.0
libtpu: 0.0.40
codegen_flags: <defaults>
</compile_context>

<pallas_src>
import functools

import jax
import jax.numpy as jnp
import numpy as np
from jax.experimental import pallas as pl
from jax.experimental.pallas import tpu as pltpu


def _rbf_kernel(inv_d_ref, x_ref, g_ref, o_ref, *, ndim, tb, tg):
    # inv_d_ref: (ndim,) f32 in SMEM (scalar reads)
    # x_ref:     (B, ndim) f32, whole array resident in VMEM
    # g_ref:     (ndim, G) f32, whole array resident in VMEM (lane-dense)
    # o_ref:     (tb, tg)  f32 output tile
    i = pl.program_id(0)
    j = pl.program_id(1)
    r0 = pl.multiple_of(i * tb, tb)
    c0 = pl.multiple_of(j * tg, tg)

    acc = jnp.zeros((tb, tg), jnp.float32)
    # ndim is tiny and static -> unrolled Python loop; each iteration is a
    # (tb,1)x(1,tg) broadcast subtract + scalar-recip multiply + FMA on the VPU.
    for k in range(ndim):
        xk = x_ref[pl.ds(r0, tb), k:k + 1]        # (tb, 1)
        gk = g_ref[k:k + 1, pl.ds(c0, tg)]        # (1, tg)
        diff = (xk - gk) * inv_d_ref[k]           # scalar recip, no vector div
        acc = acc + diff * diff
    # exp is the only EUP op per element.
    o_ref[...] = 2.0 * jnp.exp(-acc)


def _pick_tile(extent, cap, align):
    """Largest multiple of `align` <= cap that divides `extent`; else full extent."""
    if extent <= cap:
        return extent
    t = (cap // align) * align
    while t >= align:
        if extent % t == 0:
            return t
        t -= align
    return extent  # fall back to full extent (always a legal block shape)


def rbf_grid_forward(x, grid, d, *, tb_cap=512, tg_cap=2048):
    """x: (B, ndim) f32; grid: (ndim, G) f32; d: (ndim,) f32 -> (B, G) f32."""
    B, ndim = x.shape
    _, G = grid.shape

    tb = _pick_tile(B, tb_cap, 8)     # sublane tile
    tg = _pick_tile(G, tg_cap, 128)   # lane tile (lane-dense output stores)

    inv_d = (1.0 / d).astype(jnp.float32)

    # VMEM budget: double-buffered output tile + whole-array-resident inputs.
    out_tile_bytes = 2 * tb * tg * 4
    resident_bytes = B * ndim * 4 + ndim * G * 4
    needed = out_tile_bytes + resident_bytes + (1 << 20)
    vmem_limit = int(min(max(2 * needed, 16 << 20), 40 << 20))

    kernel = functools.partial(_rbf_kernel, ndim=ndim, tb=tb, tg=tg)
    return pl.pallas_call(
        kernel,
        out_shape=jax.ShapeDtypeStruct((B, G), jnp.float32),
        grid=(B // tb, G // tg),
        in_specs=[
            # inv_d: whole array in SMEM (scalar reads only).
            pl.BlockSpec(memory_space=pltpu.MemorySpace.SMEM),
            # x, grid: tiny -> whole-array resident in VMEM, sliced in-kernel.
            pl.BlockSpec(memory_space=pltpu.MemorySpace.VMEM),
            pl.BlockSpec(memory_space=pltpu.MemorySpace.VMEM),
        ],
        out_specs=pl.BlockSpec((tb, tg), lambda i, j: (i, j)),
        compiler_params=pltpu.CompilerParams(
            dimension_semantics=("parallel", "parallel"),
            vmem_limit_bytes=vmem_limit),
    )(inv_d, x, grid)


def make_rbf_params(ndim, ngrid, lim=None, sigma=0.75):
    """Deterministic parameter construction, mirroring RBFGrid.__init__."""
    if lim is None:
        lim = [(-1.0, 1.0)] * ndim
    d = np.array([(hi - lo) / ngrid * sigma for (lo, hi) in lim],
                 dtype=np.float32)
    grid = np.stack(
        np.meshgrid(*[np.linspace(lo, hi, ngrid) for (lo, hi) in lim])
    ).reshape((ndim, -1)).astype(np.float32)
    return jnp.asarray(d), jnp.asarray(grid)


def rbf_ref(x, grid, d):
    """Pure-JAX reference identical to the PyTorch forward."""
    dists = (x[:, :, None] - grid[None, :, :]) / d[None, :, None]
    return 2.0 * jnp.exp(-jnp.sum(dists * dists, axis=1))


if __name__ == "__main__":
    ndim, ngrid = 2, 16          # G = ngrid**ndim = 256
    B = 64
    d, grid = make_rbf_params(ndim, ngrid)

    key = jax.random.PRNGKey(0)
    x = jax.random.uniform(key, (B, ndim), dtype=jnp.float32,
                           minval=-1.0, maxval=1.0)

    out = rbf_grid_forward(x, grid, d)
    out = jax.block_until_ready(out)

    ref = rbf_ref(x, grid, d)
    assert out.shape == (B, ngrid ** ndim)
    np.testing.assert_allclose(np.asarray(out), np.asarray(ref),
                               rtol=1e-5, atol=1e-5)
    print("KERNEL_OK")
</pallas_src>

<mosaic_0001>
module attributes {stable_mosaic.version = 11 : i64} {
  func.func @_rbf_kernel(%arg0: i32, %arg1: i32, %arg2: memref<2xf32, #tpu.memory_space<smem>>, %arg3: memref<64x2xf32, #tpu.memory_space<vmem>>, %arg4: memref<2x256xf32, #tpu.memory_space<vmem>>, %arg5: memref<64x256xf32, #tpu.memory_space<vmem>>) attributes {dimension_semantics = [#tpu.dimension_semantics<parallel>, #tpu.dimension_semantics<parallel>], iteration_bounds = array<i64: 1, 1>, scalar_prefetch = 0 : i64, scratch_operands = 0 : i64, tpu.core_type = #tpu.core_type<tc>, window_params = [{transform_indices = @transform_0, window_bounds = array<i64: 2>}, {pipeline_mode = #tpu.pipeline_mode<synchronous>, transform_indices = @transform_1, window_bounds = array<i64: 64, 2>}, {pipeline_mode = #tpu.pipeline_mode<synchronous>, transform_indices = @transform_2, window_bounds = array<i64: 2, 256>}, {transform_indices = @transform_3, window_bounds = array<i64: 64, 256>}]} {
    %c64_i32 = arith.constant 64 : i32
    %0 = arith.muli %arg0, %c64_i32 : i32
    %1 = tpu.assume_multiple %0, 64 : i32
    %c256_i32 = arith.constant 256 : i32
    %2 = arith.muli %arg1, %c256_i32 : i32
    %3 = tpu.assume_multiple %2, 256 : i32
    %cst = arith.constant 0.000000e+00 : f32
    %4 = vector.broadcast %cst : f32 to vector<64x256xf32>
    %5 = arith.index_cast %1 : i32 to index
    %c0 = arith.constant 0 : index
    %6 = vector.load %arg3[%5, %c0] : memref<64x2xf32, #tpu.memory_space<vmem>>, vector<64x1xf32>
    %c0_0 = arith.constant 0 : index
    %7 = arith.index_cast %3 : i32 to index
    %8 = vector.load %arg4[%c0_0, %7] : memref<2x256xf32, #tpu.memory_space<vmem>>, vector<1x256xf32>
    %9 = vector.broadcast %6 : vector<64x1xf32> to vector<64x256xf32>
    %10 = vector.broadcast %8 : vector<1x256xf32> to vector<64x256xf32>
    %11 = arith.subf %9, %10 : vector<64x256xf32>
    %c0_1 = arith.constant 0 : index
    %12 = memref.load %arg2[%c0_1] : memref<2xf32, #tpu.memory_space<smem>>
    %13 = vector.broadcast %12 : f32 to vector<64x256xf32>
    %14 = arith.mulf %11, %13 : vector<64x256xf32>
    %15 = arith.mulf %14, %14 : vector<64x256xf32>
    %16 = arith.addf %4, %15 : vector<64x256xf32>
    %17 = arith.index_cast %1 : i32 to index
    %c1 = arith.constant 1 : index
    %18 = vector.load %arg3[%17, %c1] : memref<64x2xf32, #tpu.memory_space<vmem>>, vector<64x1xf32>
    %c1_2 = arith.constant 1 : index
    %19 = arith.index_cast %3 : i32 to index
    %20 = vector.load %arg4[%c1_2, %19] : memref<2x256xf32, #tpu.memory_space<vmem>>, vector<1x256xf32>
    %21 = vector.broadcast %18 : vector<64x1xf32> to vector<64x256xf32>
    %22 = vector.broadcast %20 : vector<1x256xf32> to vector<64x256xf32>
    %23 = arith.subf %21, %22 : vector<64x256xf32>
    %c1_3 = arith.constant 1 : index
    %24 = memref.load %arg2[%c1_3] : memref<2xf32, #tpu.memory_space<smem>>
    %25 = vector.broadcast %24 : f32 to vector<64x256xf32>
    %26 = arith.mulf %23, %25 : vector<64x256xf32>
    %27 = arith.mulf %26, %26 : vector<64x256xf32>
    %28 = arith.addf %16, %27 : vector<64x256xf32>
    %cst_4 = arith.constant 0.000000e+00 : f32
    %29 = vector.broadcast %cst_4 : f32 to vector<64x256xf32>
    %30 = arith.subf %29, %28 : vector<64x256xf32>
    %31 = math.exp %30 : vector<64x256xf32>
    %cst_5 = arith.constant 2.000000e+00 : f32
    %32 = vector.broadcast %cst_5 : f32 to vector<64x256xf32>
    %33 = arith.mulf %32, %31 : vector<64x256xf32>
    %c0_6 = arith.constant 0 : index
    %c0_7 = arith.constant 0 : index
    %34 = vector.load %arg5[%c0_6, %c0_7] : memref<64x256xf32, #tpu.memory_space<vmem>>, vector<64x256xf32>
    tpu.vector_store %arg5[%c0_6, %c0_7], %33 {strides = array<i32>} : memref<64x256xf32, #tpu.memory_space<vmem>>, vector<64x256xf32>,
    return
  }
  func.func @transform_0(%arg0: i32, %arg1: i32) -> i32 {
    %c0_i32 = arith.constant 0 : i32
    %c0_i32_0 = arith.constant 0 : i32
    return %c0_i32 : i32
  }
  func.func @transform_1(%arg0: i32, %arg1: i32) -> (i32, i32) {
    %c0_i32 = arith.constant 0 : i32
    %c0_i32_0 = arith.constant 0 : i32
    %c0_i32_1 = arith.constant 0 : i32
    return %c0_i32, %c0_i32_0 : i32, i32
  }
  func.func @transform_2(%arg0: i32, %arg1: i32) -> (i32, i32) {
    %c0_i32 = arith.constant 0 : i32
    %c0_i32_0 = arith.constant 0 : i32
    %c0_i32_1 = arith.constant 0 : i32
    return %c0_i32, %c0_i32_0 : i32, i32
  }
  func.func @transform_3(%arg0: i32, %arg1: i32) -> (i32, i32) {
    %c0_i32 = arith.constant 0 : i32
    return %arg0, %arg1 : i32, i32
  }
}

</mosaic_0001>

<bundles_post_ra>
// kernel: tpu_custom_call.1
= control target key start
LH: loop header
LB: loop body
LE: loop exit
PB: predicated region body
PF: predicated region fallthrough
CT: control target
= control target key end

     0   :  { %8 = vsyncpa [#allocation4], 0  ;;  %s586_s0 = inlined_call_operand.vmem [shape: f32[2], index: 0, kind: input, shape index: {}]   ;;  %s587_s1 = inlined_call_operand.vmem [shape: f32[64,2], index: 1, kind: input, shape index: {}]   ;;  %s588_s2 = inlined_call_operand.vmem [shape: f32[2,256], index: 2, kind: input, shape index: {}]   ;;  %s589_s3 = inlined_call_operand.hbm [shape: f32[64,256], index: 3, kind: output, shape index: {}]  }
   0x1   :  { %9 = vsyncpa [#allocation3], 0  ;;  %s16_s14 = sshll.u32 %s586_s0, 4  ;;  %s17_s14 = int_to_ptr.vmem [resolvable:$true] %s16_s14 }
   0x2   :  { %s415_s15 = scalar_lea.vmem %s17_s14, 16  ;;  %p420_p1 = scmp.lt.s32.totalorder %s17_s14, %s17_s14 }
   0x3   :  { %p416_p0 = scmp.ne.s32.totalorder %s17_s14, %s415_s15  ;;  %p421_p2 = scmp.lt.s32.totalorder %s415_s15, %s415_s15 }
   0x5   :  { %p422_p3 = por %p421_p2, %p420_p1 }
   0x7   :  { %p423_p4 = pnand %p422_p3, %p416_p0 }
   0x9   :  { %426 = shalt.err (!%p423_p4)
}
   0xa   :  { %s453_s16 = smov [#allocation2]  }
   0xb   :  { %19 = dma.vmem_to_smem %s17_s14, 16, %s453_s16, [#allocation4]  }
   0xc   :  { %449 = dma.done.wait [#allocation4], 16  }
   0xd   :  { %450 = vsyncadd [#allocation4], 4294967280 }
   0xe   :  { %27 = sfence }
   0xf   :  { %v33_v0 = vld [vmem:[%s587_s1 + $0x10] sm:$0xff]  ;;  %v31_v1 = vld [vmem:[%s587_s1] sm:$0xff]  ;;  %v454_v2 = vmov 0   ;;  %v34_v3 = vld [vmem:[%s587_s1 + $0x18] sm:$0xff]  ;;  %v455_v9 = vmov 1   ;;  %v85_v10 = vlaneseq  ;;  %s111_s5 = sld [smem:[#allocation2]] }
  0x10   :  { %380 = vset.pattern.permute.xlu1 %v454_v2  ;;  %379 = vset.pattern.permute.xlu0 %v454_v2  ;;  %v32_v4 = vld [vmem:[%s587_s1 + $0x8] sm:$0xff]  ;;  %v35_v6 = vld [vmem:[%s587_s1 + $0x20] sm:$0xff]  ;;  %v38_v7 = vld [vmem:[%s587_s1 + $0x38] sm:$0xff]  ;;  %s372_s7 = sld [smem:[#allocation2 + $0x1]] }
  0x11   :  { %56 = vperm.xlu1 %380, %v33_v0   ;;  %46 = vperm.xlu0 %379, %v31_v1   ;;  %v36_v5 = vld [vmem:[%s587_s1 + $0x28] sm:$0xff]  ;;  %v37_v8 = vld [vmem:[%s587_s1 + $0x30] sm:$0xff]  ;;  %v86_v11 = vshrl.u32 %v85_v10, 7  ;;  %v43_v14 = vld [vmem:[%s588_s2] ss:$2 sm:$0x3] }
  0x12   :  { %v371_v26 = vld [vmem:[%s588_s2 + $0x1] ss:$2 sm:$0x3]  ;;  %s456_s2 = smov [#allocation5]  }
  0x13   :  { %v87_v12 = vsub.s32 0, %v86_v11  ;;  %v91_v13 = vsub.s32 1, %v86_v11  ;;  %s357_s10 = sshll.u32 %s456_s2, 4  ;;  %s358_s10 = int_to_ptr.vmem [resolvable:$true] %s357_s10 }
  0x14   :  { %s427_s11 = scalar_lea.vmem %s358_s10, 2048  ;;  %p432_p6 = scmp.lt.s32.totalorder %s358_s10, %s358_s10 }
  0x15   :  { %61 = vperm.xlu1 %380, %v34_v3   ;;  %51 = vperm.xlu0 %379, %v32_v4   ;;  %v88_v17 = vrot.slane %v43_v14, %v87_v12  ;;  %v92_v18 = vrot.slane %v43_v14, %v91_v13  ;;  %v112_v21 = vstv %s111_s5  ;;  %v512_v37 = vrot.slane %v371_v26, %v87_v12  ;;  %p428_p5 = scmp.ne.s32.totalorder %s358_s10, %s427_s11  ;;  %p433_p7 = scmp.lt.s32.totalorder %s427_s11, %s427_s11 }
  0x16   :  { %v514_v38 = vrot.slane %v371_v26, %v91_v13  ;;  %v516_v39 = vstv %s372_s7 }
  0x17   :  { %p434_p8 = por %p433_p7, %p432_p6 }
  0x19   :  { %71 = vperm.xlu1 %380, %v36_v5   ;;  %66 = vperm.xlu0 %379, %v35_v6   ;;  %p435_p9 = pnand %p434_p8, %p428_p5 }
  0x1d   :  { %81 = vperm.xlu1 %380, %v38_v7   ;;  %76 = vperm.xlu0 %379, %v37_v8  }
  0x21   :  { %382 = vset.pattern.permute.xlu1 %v455_v9  ;;  %381 = vset.pattern.permute.xlu0 %v455_v9 }
  0x22   :  { %168 = vperm.xlu1 %382, %v32_v4   ;;  %164 = vperm.xlu0 %381, %v31_v1  }
  0x26   :  { %172 = vperm.xlu1 %382, %v33_v0   ;;  %176 = vperm.xlu0 %381, %v34_v3  }
  0x2a   :  { %180 = vperm.xlu1 %382, %v35_v6   ;;  %184 = vperm.xlu0 %381, %v36_v5  }
  0x2e   :  { %188 = vperm.xlu1 %382, %v37_v8   ;;  %192 = vperm.xlu0 %381, %v38_v7  }
  0x90   :  { %v57_v15 = vpop.permute.xlu1 %56  ;;  %v47_v16 = vpop.permute.xlu0 %46 }
  0x91   :  { %v99_v22 = vsub.f32 %v57_v15, %v88_v17  ;;  %v100_v23 = vsub.f32 %v57_v15, %v92_v18  ;;  %v95_v24 = vsub.f32 %v47_v16, %v88_v17  ;;  %v96_v25 = vsub.f32 %v47_v16, %v92_v18 }
  0x93   :  { %v117_v40 = vmul.f32 %v112_v21, %v99_v22  ;;  %v118_v41 = vmul.f32 %v112_v21, %v100_v23  ;;  %v113_v42 = vmul.f32 %v112_v21, %v95_v24  ;;  %v114_v43 = vmul.f32 %v112_v21, %v96_v25 }
  0x94   :  { %v62_v19 = vpop.permute.xlu1 %61  ;;  %v52_v20 = vpop.permute.xlu0 %51 }
  0x95   :  { %v101_v27 = vsub.f32 %v62_v19, %v88_v17  ;;  %v102_v28 = vsub.f32 %v62_v19, %v92_v18  ;;  %v97_v29 = vsub.f32 %v52_v20, %v88_v17  ;;  %v98_v30 = vsub.f32 %v52_v20, %v92_v18 }
  0x96   :  { %v133_v58 = vmul.f32 %v117_v40, %v117_v40  ;;  %v134_v59 = vmul.f32 %v118_v41, %v118_v41  ;;  %v129_v60 = vmul.f32 %v113_v42, %v113_v42  ;;  %v130_v61 = vmul.f32 %v114_v43, %v114_v43 }
  0x97   :  { %v119_v44 = vmul.f32 %v112_v21, %v101_v27  ;;  %v120_v45 = vmul.f32 %v112_v21, %v102_v28  ;;  %v115_v46 = vmul.f32 %v112_v21, %v97_v29  ;;  %v116_v47 = vmul.f32 %v112_v21, %v98_v30 }
  0x98   :  { %v72_v31 = vpop.permute.xlu1 %71  ;;  %v67_v32 = vpop.permute.xlu0 %66 }
  0x99   :  { %v105_v33 = vsub.f32 %v72_v31, %v88_v17  ;;  %v106_v34 = vsub.f32 %v72_v31, %v92_v18  ;;  %v103_v35 = vsub.f32 %v67_v32, %v88_v17  ;;  %v104_v36 = vsub.f32 %v67_v32, %v92_v18 }
  0x9a   :  { %v135_v2 = vmul.f32 %v119_v44, %v119_v44  ;;  %v136_v3 = vmul.f32 %v120_v45, %v120_v45  ;;  %v131_v4 = vmul.f32 %v115_v46, %v115_v46  ;;  %v132_v5 = vmul.f32 %v116_v47, %v116_v47 }
  0x9b   :  { %v123_v50 = vmul.f32 %v112_v21, %v105_v33  ;;  %v124_v51 = vmul.f32 %v112_v21, %v106_v34  ;;  %v121_v52 = vmul.f32 %v112_v21, %v103_v35  ;;  %v122_v53 = vmul.f32 %v112_v21, %v104_v36 }
  0x9c   :  { %v82_v48 = vpop.permute.xlu1 %81  ;;  %v77_v49 = vpop.permute.xlu0 %76 }
  0x9d   :  { %v109_v54 = vsub.f32 %v82_v48, %v88_v17  ;;  %v110_v55 = vsub.f32 %v82_v48, %v92_v18  ;;  %v107_v56 = vsub.f32 %v77_v49, %v88_v17  ;;  %v108_v57 = vsub.f32 %v77_v49, %v92_v18 }
  0x9e   :  { %v518_v8 = vmul.f32 %v123_v50, %v123_v50  ;;  %v520_v9 = vmul.f32 %v124_v51, %v124_v51  ;;  %v522_v10 = vmul.f32 %v121_v52, %v121_v52  ;;  %v524_v11 = vmul.f32 %v122_v53, %v122_v53 }
  0x9f   :  { %v127_v62 = vmul.f32 %v112_v21, %v109_v54  ;;  %v128_v63 = vmul.f32 %v112_v21, %v110_v55  ;;  %v125_v0 = vmul.f32 %v112_v21, %v107_v56  ;;  %v126_v1 = vmul.f32 %v112_v21, %v108_v57 }
  0xa1   :  { %v169_v6 = vpop.permute.xlu1 %168  ;;  %v165_v7 = vpop.permute.xlu0 %164  ;;  %v530_v16 = vmul.f32 %v127_v62, %v127_v62  ;;  %v532_v17 = vmul.f32 %v128_v63, %v128_v63  ;;  %v534_v18 = vmul.f32 %v125_v0, %v125_v0  ;;  %v536_v19 = vmul.f32 %v126_v1, %v126_v1 }
  0xa2   :  { %v208_v12 = vsub.f32 %v169_v6, %v512_v37  ;;  %v209_v13 = vsub.f32 %v169_v6, %v514_v38  ;;  %v206_v14 = vsub.f32 %v165_v7, %v512_v37  ;;  %v207_v15 = vsub.f32 %v165_v7, %v514_v38 }
  0xa4   :  { %v226_v20 = vmul.f32 %v516_v39, %v208_v12  ;;  %v227_v21 = vmul.f32 %v516_v39, %v209_v13  ;;  %v224_v22 = vmul.f32 %v516_v39, %v206_v14  ;;  %v225_v23 = vmul.f32 %v516_v39, %v207_v15 }
  0xa5   :  { %v173_v24 = vpop.permute.xlu1 %172  ;;  %v177_v25 = vpop.permute.xlu0 %176 }
  0xa6   :  { %v210_v26 = vsub.f32 %v173_v24, %v512_v37  ;;  %v211_v27 = vsub.f32 %v173_v24, %v514_v38  ;;  %v212_v28 = vsub.f32 %v177_v25, %v512_v37  ;;  %v213_v29 = vsub.f32 %v177_v25, %v514_v38 }
  0xa7   :  { %v242_v30 = vmul.f32 %v226_v20, %v226_v20  ;;  %v243_v31 = vmul.f32 %v227_v21, %v227_v21  ;;  %v240_v32 = vmul.f32 %v224_v22, %v224_v22  ;;  %v241_v33 = vmul.f32 %v225_v23, %v225_v23 }
  0xa8   :  { %v228_v34 = vmul.f32 %v516_v39, %v210_v26  ;;  %v229_v35 = vmul.f32 %v516_v39, %v211_v27  ;;  %v230_v36 = vmul.f32 %v516_v39, %v212_v28  ;;  %v231_v40 = vmul.f32 %v516_v39, %v213_v29 }
  0xa9   :  { %v258_v41 = vadd.f32 %v242_v30, %v131_v4  ;;  %v259_v42 = vadd.f32 %v243_v31, %v132_v5  ;;  %v256_v43 = vadd.f32 %v240_v32, %v129_v60  ;;  %v257_v44 = vadd.f32 %v241_v33, %v130_v61  ;;  %v181_v45 = vpop.permute.xlu1 %180  ;;  %v185_v6 = vpop.permute.xlu0 %184 }
  0xaa   :  { %v244_v46 = vmul.f32 %v228_v34, %v228_v34  ;;  %v245_v47 = vmul.f32 %v229_v35, %v229_v35  ;;  %v246_v48 = vmul.f32 %v230_v36, %v230_v36  ;;  %v247_v49 = vmul.f32 %v231_v40, %v231_v40 }
  0xab   :  { %v274_v50 = vsub.f32 0.0, %v258_v41  ;;  %v275_v51 = vsub.f32 0.0, %v259_v42  ;;  %v272_v52 = vsub.f32 0.0, %v256_v43  ;;  %v273_v53 = vsub.f32 0.0, %v257_v44 }
  0xac   :  { %v260_v54 = vadd.f32 %v244_v46, %v133_v58  ;;  %v261_v55 = vadd.f32 %v245_v47, %v134_v59  ;;  %v262_v56 = vadd.f32 %v246_v48, %v135_v2  ;;  %v263_v57 = vadd.f32 %v247_v49, %v136_v3 }
  0xad   :  { %v292_v62 = vmul.f32 1.442695, %v274_v50  ;;  %v294_v63 = vmul.f32 1.442695, %v275_v51  ;;  %v288_v0 = vmul.f32 1.442695, %v272_v52  ;;  %v214_v1 = vsub.f32 %v181_v45, %v512_v37  ;;  %v189_v58 = vpop.permute.xlu1 %188  ;;  %v193_v30 = vpop.permute.xlu0 %192 }
  0xae   :  { %v290_v60 = vmul.f32 1.442695, %v273_v53  ;;  %v276_v61 = vsub.f32 0.0, %v260_v54  ;;  %v277_v4 = vsub.f32 0.0, %v261_v55  ;;  %v278_v5 = vsub.f32 0.0, %v262_v56 }
  0xaf   :  { %383 = vpow2.f32 %v292_v62  ;;  %v279_v7 = vsub.f32 0.0, %v263_v57  ;;  %v215_v12 = vsub.f32 %v181_v45, %v514_v38  ;;  %v232_v13 = vmul.f32 %v516_v39, %v214_v1 }
  0xb0   :  { %385 = vpow2.f32 %v294_v63  ;;  %v296_v59 = vmul.f32 1.442695, %v276_v61  ;;  %v298_v2 = vmul.f32 1.442695, %v277_v4  ;;  %v300_v3 = vmul.f32 1.442695, %v278_v5 }
  0xb1   :  { %387 = vpow2.f32 %v288_v0  ;;  %v302_v14 = vmul.f32 1.442695, %v279_v7  ;;  %v233_v15 = vmul.f32 %v516_v39, %v215_v12  ;;  %v248_v20 = vmul.f32 %v232_v13, %v232_v13 }
  0xb2   :  { %389 = vpow2.f32 %v290_v60  ;;  %v216_v21 = vsub.f32 %v185_v6, %v512_v37  ;;  %v217_v22 = vsub.f32 %v185_v6, %v514_v38  ;;  %v218_v23 = vsub.f32 %v189_v58, %v512_v37 }
  0xb3   :  { %391 = vpow2.f32 %v296_v59  ;;  %v249_v24 = vmul.f32 %v233_v15, %v233_v15  ;;  %v264_v25 = vadd.f32 %v248_v20, %v522_v10  ;;  %v219_v26 = vsub.f32 %v189_v58, %v514_v38 }
  0xb4   :  { %393 = vpow2.f32 %v298_v2  ;;  %v234_v27 = vmul.f32 %v516_v39, %v216_v21  ;;  %v235_v28 = vmul.f32 %v516_v39, %v217_v22  ;;  %v236_v29 = vmul.f32 %v516_v39, %v218_v23 }
  0xb5   :  { %395 = vpow2.f32 %v300_v3  ;;  %v265_v31 = vadd.f32 %v249_v24, %v524_v11  ;;  %v280_v32 = vsub.f32 0.0, %v264_v25  ;;  %v237_v33 = vmul.f32 %v516_v39, %v219_v26 }
  0xb6   :  { %397 = vpow2.f32 %v302_v14  ;;  %v250_v34 = vmul.f32 %v234_v27, %v234_v27  ;;  %v251_v35 = vmul.f32 %v235_v28, %v235_v28  ;;  %v252_v10 = vmul.f32 %v236_v29, %v236_v29 }
  0xb7   :  { %v281_v36 = vsub.f32 0.0, %v265_v31  ;;  %v304_v40 = vmul.f32 1.442695, %v280_v32  ;;  %v253_v41 = vmul.f32 %v237_v33, %v237_v33  ;;  %v220_v42 = vsub.f32 %v193_v30, %v512_v37 }
  0xb8   :  { %v266_v43 = vadd.f32 %v250_v34, %v518_v8  ;;  %v267_v44 = vadd.f32 %v251_v35, %v520_v9  ;;  %v268_v45 = vadd.f32 %v252_v10, %v534_v18  ;;  %v221_v11 = vsub.f32 %v193_v30, %v514_v38 }
  0xb9   :  { %v384_v46 = vpop.eup %383  ;;  %399 = vpow2.f32 %v304_v40  ;;  %v306_v47 = vmul.f32 1.442695, %v281_v36  ;;  %v269_v48 = vadd.f32 %v253_v41, %v536_v19  ;;  %v238_v49 = vmul.f32 %v516_v39, %v220_v42 }
  0xba   :  { %v386_v50 = vpop.eup %385  ;;  %v322_v51 = vmul.f32 2.0, %v384_v46  ;;  %v282_v52 = vsub.f32 0.0, %v266_v43  ;;  %v283_v53 = vsub.f32 0.0, %v267_v44  ;;  %v284_v37 = vsub.f32 0.0, %v268_v45 }
  0xbb   :  { %v388_v54 = vpop.eup %387  ;;  %v323_v8 = vmul.f32 2.0, %v386_v50  ;;  %401 = vpow2.f32 %v306_v47  ;;  %v285_v9 = vsub.f32 0.0, %v269_v48  ;;  %v239_v18 = vmul.f32 %v516_v39, %v221_v11 }
  0xbc   :  { %v390_v55 = vpop.eup %389  ;;  %338 = vst [vmem:[#allocation5 + $0x10] sm:$0xff] %v322_v51  ;;  %v320_v38 = vmul.f32 2.0, %v388_v54  ;;  %v308_v56 = vmul.f32 1.442695, %v282_v52  ;;  %v310_v57 = vmul.f32 1.442695, %v283_v53  ;;  %v254_v62 = vmul.f32 %v238_v49, %v238_v49 }
  0xbd   :  { %v392_v19 = vpop.eup %391  ;;  %339 = vst [vmem:[#allocation5 + $0x18] sm:$0xff] %v323_v8  ;;  %v321_v63 = vmul.f32 2.0, %v390_v55  ;;  %v312_v0 = vmul.f32 1.442695, %v284_v37  ;;  %v314_v1 = vmul.f32 1.442695, %v285_v9  ;;  %v255_v60 = vmul.f32 %v239_v18, %v239_v18 }
  0xbe   :  { %v394_v61 = vpop.eup %393  ;;  %336 = vst [vmem:[#allocation5] sm:$0xff] %v320_v38  ;;  %v324_v4 = vmul.f32 2.0, %v392_v19  ;;  %403 = vpow2.f32 %v308_v56  ;;  %v270_v5 = vadd.f32 %v254_v62, %v530_v16 }
  0xbf   :  { %v396_v6 = vpop.eup %395  ;;  %337 = vst [vmem:[#allocation5 + $0x8] sm:$0xff] %v321_v63  ;;  %v325_v39 = vmul.f32 2.0, %v394_v61  ;;  %405 = vpow2.f32 %v310_v57  ;;  %v271_v7 = vadd.f32 %v255_v60, %v532_v17 }
  0xc0   :  { %v398_v12 = vpop.eup %397  ;;  %340 = vst [vmem:[#allocation5 + $0x20] sm:$0xff] %v324_v4  ;;  %v326_v13 = vmul.f32 2.0, %v396_v6  ;;  %407 = vpow2.f32 %v312_v0  ;;  %v286_v58 = vsub.f32 0.0, %v270_v5 }
  0xc1   :  { %341 = vst [vmem:[#allocation5 + $0x28] sm:$0xff] %v325_v39  ;;  %v327_v59 = vmul.f32 2.0, %v398_v12  ;;  %409 = vpow2.f32 %v314_v1  ;;  %v287_v2 = vsub.f32 0.0, %v271_v7 }
  0xc2   :  { %342 = vst [vmem:[#allocation5 + $0x30] sm:$0xff] %v326_v13  ;;  %v316_v3 = vmul.f32 1.442695, %v286_v58 }
  0xc3   :  { %v400_v14 = vpop.eup %399  ;;  %343 = vst [vmem:[#allocation5 + $0x38] sm:$0xff] %v327_v59  ;;  %v318_v16 = vmul.f32 1.442695, %v287_v2 }
  0xc4   :  { %v328_v15 = vmul.f32 2.0, %v400_v14  ;;  %411 = vpow2.f32 %v316_v3 }
  0xc5   :  { %v402_v20 = vpop.eup %401  ;;  %413 = vpow2.f32 %v318_v16 }
  0xc6   :  { %v329_v21 = vmul.f32 2.0, %v402_v20  ;;  %344 = vst [vmem:[#allocation5 + $0x40] sm:$0xff] %v328_v15 }
  0xc8   :  { %v404_v17 = vpop.eup %403  ;;  %345 = vst [vmem:[#allocation5 + $0x48] sm:$0xff] %v329_v21 }
  0xc9   :  { %v406_v22 = vpop.eup %405  ;;  %v330_v23 = vmul.f32 2.0, %v404_v17 }
  0xca   :  { %v408_v24 = vpop.eup %407  ;;  %v331_v25 = vmul.f32 2.0, %v406_v22 }
  0xcb   :  { %v410_v26 = vpop.eup %409  ;;  %346 = vst [vmem:[#allocation5 + $0x50] sm:$0xff] %v330_v23  ;;  %v332_v27 = vmul.f32 2.0, %v408_v24 }
  0xcc   :  { %347 = vst [vmem:[#allocation5 + $0x58] sm:$0xff] %v331_v25  ;;  %v333_v28 = vmul.f32 2.0, %v410_v26 }
  0xcd   :  { %348 = vst [vmem:[#allocation5 + $0x60] sm:$0xff] %v332_v27 }
  0xce   :  { %v412_v29 = vpop.eup %411  ;;  %349 = vst [vmem:[#allocation5 + $0x68] sm:$0xff] %v333_v28 }
  0xcf   :  { %v414_v30 = vpop.eup %413  ;;  %v334_v31 = vmul.f32 2.0, %v412_v29 }
  0xd0   :  { %v335_v32 = vmul.f32 2.0, %v414_v30 }
  0xd1   :  { %350 = vst [vmem:[#allocation5 + $0x70] sm:$0xff] %v334_v31 }
  0xd2   :  { %351 = vst [vmem:[#allocation5 + $0x78] sm:$0xff] %v335_v32 }
  0xd3   :  { %438 = shalt.err (!%p435_p9)
}
  0xd4   :  { %s439_s14 = scalar_lea.hbm %s589_s3, 2048 }
  0xd5   :  { %p440_p10 = scmp.ne.s32.totalorder %s589_s3, %s439_s14  ;;  %p443_p11 = scmp.lt.u32.totalorder %s439_s14, %s589_s3 }
  0xd7   :  { %p445_p12 = pnand %p443_p11, %p440_p10 }
  0xd9   :  { %448 = shalt.err (!%p445_p12)
}
  0xda   :  { %s457_s19 = smov 256   ;;  %s458_s20 = smov 16  }
  0xdb   :  { %363 = dma.vmem_to_hbm [thread:$0]  %s358_s10, 2048, %s589_s3, [#allocation3], %s457_s19, %s457_s19, %s458_s20  }
  0xdc   :  { %451 = dma.done.wait [#allocation3], 2048  }
  0xdd   :  { %452 = vsyncadd [#allocation3], 4294965248 }
  0xde   :  { %367 = vsyncpa [#allocation3], 1 }
  0xdf   :  { %368 = vsyncpa [#allocation4], 1 }

</bundles_post_ra>
